<compile_context>
chip_gen: v5e
topology: v5e:2x2
jax: 0.10.0
libtpu: 0.0.40
codegen_flags: <defaults>
</compile_context>

<pallas_src>
import functools

import jax
import jax.numpy as jnp
from jax import lax
from jax.experimental import pallas as pl
from jax.experimental.pallas import tpu as pltpu


def gat_fused_kernel(x_ref, w_ref, a12_ref, adj_ref, out_ref, *,
                     alpha, nheads, nhid, tb):
    """One grid step: TB batch elements, all heads, output in final layout."""
    V = x_ref.shape[1]
    F_in = x_ref.shape[2]
    E = nhid
    H = nheads
    HE = H * E

    # ---- one tall MXU projection for every batch element and head in the block
    # (TB, V, F) -> (TB*V, F): V sits on the sublane dim, so this merge is cheap.
    h_flat = x_ref[...].reshape(tb * V, F_in)
    Wh_all = jnp.dot(h_flat, w_ref[...],
                     preferred_element_type=jnp.float32)          # (TB*V, H*E)

    # ---- all per-head f1/f2 dot products in ONE block-structured matmul.
    # a12_ref is (H*E, 2H): column hd holds a1 of head hd (in its E-block),
    # column H+hd holds a2; zeros elsewhere.
    f12 = jnp.dot(Wh_all, a12_ref[...],
                  preferred_element_type=jnp.float32)             # (TB*V, 2H)

    Wh_r = Wh_all.reshape(tb, V, HE)                              # (TB, V, H*E)
    f12_r = f12.reshape(tb, V, 2 * H)                             # (TB, V, 2H)

    ones_col = jnp.ones((tb, V, 1), jnp.float32)                  # hoisted

    head_outs = []
    for hd in range(H):                       # H is small & static -> unrolled
        Wh_hd = Wh_r[:, :, hd * E:(hd + 1) * E]                   # (TB, V, E)
        f1_h = f12_r[:, :, hd:hd + 1]                             # (TB, V, 1)
        f2_h = f12_r[:, :, H + hd:H + hd + 1]                     # (TB, V, 1)

        # e[b,i,j] = f1[b,i] + f2[b,j], built as a batched rank-2 matmul
        # [f1,1] @ [1,f2]^T so no transpose / lane-split reshape is needed.
        p_mat = jnp.concatenate([f1_h, ones_col], axis=-1)        # (TB, V, 2)
        q_mat = jnp.concatenate([ones_col, f2_h], axis=-1)        # (TB, V, 2)
        e = jnp.einsum('bik,bjk->bij', p_mat, q_mat,
                       preferred_element_type=jnp.float32)        # (TB, V, V)

        # LeakyReLU(alpha)
        e = jnp.where(e > 0, e, alpha * e)

        # softmax over neighbours (last axis); exact reciprocal for 1e-4 tol
        e_max = jnp.max(e, axis=-1, keepdims=True)
        p = jnp.exp(e - e_max)
        att = p * pl.reciprocal(jnp.sum(p, axis=-1, keepdims=True), approx=False)

        # attention <- adj_norm @ attention ; h' = attention @ Wh (batched MXU)
        adj_bc = jnp.broadcast_to(adj_ref[hd][None], (tb, V, V))
        att = jnp.einsum('buv,bvk->buk', adj_bc, att,
                         preferred_element_type=jnp.float32)
        hp = jnp.einsum('buv,bve->bue', att, Wh_hd,
                        preferred_element_type=jnp.float32)

        # ELU, overflow-safe (exp only sees non-positive inputs)
        head_outs.append(jnp.where(hp > 0, hp,
                                   jnp.exp(jnp.minimum(hp, 0.0)) - 1.0))

    # single lane-dense full-slab store of the (TB, V, H*E) output block
    out_ref[...] = jnp.concatenate(head_outs, axis=-1).astype(out_ref.dtype)


def _pick_batch_block(n, v, target_rows=256):
    """Largest TB dividing N with TB*V <= target_rows (fills the MXU M dim);
    prefer >= 2 grid steps when the batch allows it so v7x's two TensorCores
    both get work (costs one extra ~0.5us step on single-TC v5e/v6e)."""
    tb = max(1, min(n, max(1, target_rows // max(v, 1))))
    while n % tb:
        tb -= 1
    if n // tb < 2 and n >= 2 and n % 2 == 0:
        tb = n // 2
    return tb


def gat_multihead(x, W_all, a_all, B_all, alpha):
    """x: (N, V, F); W_all: (H, F, E); a_all: (H, 2E); B_all: (H, V, V)."""
    N, V, F_in = x.shape
    H, _, E = W_all.shape

    # ---- batch-invariant precompute: one tiny XLA fusion, hoisted out of the
    # per-grid-step loop instead of being recomputed per batch element.
    # Fused projection weights (F, H*E) -> one wide matmul per step.
    W_cat = jnp.transpose(W_all, (1, 0, 2)).reshape(F_in, H * E)

    # Block-structured a-vectors: (H*E, 2H) with a1 of head hd in column hd
    # (rows hd*E:(hd+1)*E) and a2 of head hd in column H+hd.
    a1 = a_all[:, :E]
    a2 = a_all[:, E:]
    eye_h = jnp.eye(H, dtype=jnp.float32)
    A1 = (eye_h[:, None, :] * a1[:, :, None]).reshape(H * E, H)
    A2 = (eye_h[:, None, :] * a2[:, :, None]).reshape(H * E, H)
    A12 = jnp.concatenate([A1, A2], axis=1)                       # (H*E, 2H)

    # Normalized adjacency D^{-1/2}((B+I) rescaled)D^{-1/2}, per head.
    # NOTE: (mx - mn) and the row sums are intentionally left unguarded to
    # match the original module's semantics.
    eye_v = jnp.eye(V, dtype=jnp.float32)
    adj = B_all + eye_v[None]
    mn = jnp.min(adj, axis=(1, 2), keepdims=True)
    mx = jnp.max(adj, axis=(1, 2), keepdims=True)
    adj = (adj - mn) / (mx - mn)
    d_isqrt = lax.rsqrt(jnp.sum(adj, axis=2, keepdims=True))
    adj_norm = adj * d_isqrt * jnp.swapaxes(d_isqrt, 1, 2)        # (H, V, V)

    tb = _pick_batch_block(N, V)
    grid = (N // tb,)

    # VMEM guard: per-step resident bytes ~ 2*(TB*V*(F+H*E) + F*H*E + H*E*2H +
    # H*V*V)*4 (double-buffered) -- trivial here.  If V/H grow large, tile the
    # (H, V, V) operand or set vmem_limit_bytes in pltpu.CompilerParams.
    kernel = functools.partial(gat_fused_kernel, alpha=alpha,
                               nheads=H, nhid=E, tb=tb)
    out = pl.pallas_call(
        kernel,
        out_shape=jax.ShapeDtypeStruct((N, V, H * E), jnp.float32),
        grid=grid,
        in_specs=[
            pl.BlockSpec((tb, V, F_in), lambda b: (b, 0, 0)),     # x, batch block
            pl.BlockSpec((F_in, H * E), lambda b: (0, 0)),        # fused W
            pl.BlockSpec((H * E, 2 * H), lambda b: (0, 0)),       # fused a1|a2
            pl.BlockSpec((H, V, V), lambda b: (0, 0, 0)),         # adj_norm
        ],
        out_specs=pl.BlockSpec((tb, V, H * E), lambda b: (b, 0, 0)),
        compiler_params=pltpu.CompilerParams(
            dimension_semantics=("parallel",)),
    )(x, W_cat, A12, adj_norm)
    return out                                    # (N, V, H*E), final layout


def _xavier_uniform(key, shape, gain):
    fan_in, fan_out = shape[-2], shape[-1]
    bound = gain * jnp.sqrt(6.0 / (fan_in + fan_out))
    return jax.random.uniform(key, shape, jnp.float32, -bound, bound)


def _reference(x, W_all, a_all, B_all, alpha):
    """Pure-JAX reference of GATMultiHead.forward for validation."""
    V = x.shape[1]
    E = W_all.shape[-1]
    eye = jnp.eye(V, dtype=jnp.float32)
    outs = []
    for h_idx in range(W_all.shape[0]):
        W, a, B = W_all[h_idx], a_all[h_idx], B_all[h_idx]

        adj = B + eye
        adj = (adj - jnp.min(adj)) / (jnp.max(adj) - jnp.min(adj))
        d = jnp.sum(adj, axis=1)
        d_isqrt = 1.0 / jnp.sqrt(d)
        adj_norm = adj * d_isqrt[:, None] * d_isqrt[None, :]

        Wh = jnp.einsum('nvf,fe->nve', x, W)
        f1 = Wh @ a[:E]
        f2 = Wh @ a[E:]
        e = f1[:, :, None] + f2[:, None, :]
        e = jnp.where(e > 0, e, alpha * e)
        att = jax.nn.softmax(e, axis=-1)
        att = jnp.einsum('ij,njk->nik', adj_norm, att)
        hp = jnp.einsum('nij,nje->nie', att, Wh)
        outs.append(jnp.where(hp > 0, hp, jnp.exp(jnp.minimum(hp, 0.0)) - 1.0))
    return jnp.concatenate(outs, axis=-1)


if __name__ == "__main__":
    # Small, module-consistent shapes.
    N, nfeat, nhid, n_vertices, nheads = 2, 32, 16, 8, 2
    alpha = 0.2

    key = jax.random.PRNGKey(0)
    kx, kw, ka, kb = jax.random.split(key, 4)

    x = jax.random.normal(kx, (N, n_vertices, nfeat), jnp.float32)

    # Parameters consistent with __init__ (xavier_uniform gain=1.414; per-head B).
    W_all = _xavier_uniform(kw, (nheads, nfeat, nhid), gain=1.414)
    a_all = _xavier_uniform(ka, (nheads, 2 * nhid, 1), gain=1.414)[..., 0]   # (H, 2E)
    B_all = 1e-6 + 0.01 * jax.random.uniform(kb, (nheads, n_vertices, n_vertices),
                                             jnp.float32)

    fwd = jax.jit(functools.partial(gat_multihead, alpha=alpha))
    out = jax.block_until_ready(fwd(x, W_all, a_all, B_all))

    ref = _reference(x, W_all, a_all, B_all, alpha)
    assert out.shape == (N, n_vertices, nheads * nhid), out.shape
    assert jnp.allclose(out, ref, atol=1e-4, rtol=1e-4), "mismatch vs reference"

    print("KERNEL_OK")
</pallas_src>

<mosaic_0001>
module attributes {stable_mosaic.version = 11 : i64} {
  func.func @gat_fused_kernel(%arg0: i32, %arg1: memref<1x8x32xf32, #tpu.memory_space<vmem>>, %arg2: memref<32x32xf32, #tpu.memory_space<vmem>>, %arg3: memref<32x4xf32, #tpu.memory_space<vmem>>, %arg4: memref<2x8x8xf32, #tpu.memory_space<vmem>>, %arg5: memref<1x8x32xf32, #tpu.memory_space<vmem>>) attributes {dimension_semantics = [#tpu.dimension_semantics<parallel>], iteration_bounds = array<i64: 2>, scalar_prefetch = 0 : i64, scratch_operands = 0 : i64, tpu.core_type = #tpu.core_type<tc>, window_params = [{transform_indices = @transform_0, window_bounds = array<i64: 1, 8, 32>}, {pipeline_mode = #tpu.pipeline_mode<synchronous>, transform_indices = @transform_1, window_bounds = array<i64: 32, 32>}, {pipeline_mode = #tpu.pipeline_mode<synchronous>, transform_indices = @transform_2, window_bounds = array<i64: 32, 4>}, {pipeline_mode = #tpu.pipeline_mode<synchronous>, transform_indices = @transform_3, window_bounds = array<i64: 2, 8, 8>}, {transform_indices = @transform_4, window_bounds = array<i64: 1, 8, 32>}]} {
    %c0 = arith.constant 0 : index
    %c0_0 = arith.constant 0 : index
    %c0_1 = arith.constant 0 : index
    %0 = vector.load %arg1[%c0, %c0_0, %c0_1] : memref<1x8x32xf32, #tpu.memory_space<vmem>>, vector<1x8x32xf32>
    %1 = vector.shape_cast %0 : vector<1x8x32xf32> to vector<8x32xf32>
    %c0_2 = arith.constant 0 : index
    %c0_3 = arith.constant 0 : index
    %2 = vector.load %arg2[%c0_2, %c0_3] : memref<32x32xf32, #tpu.memory_space<vmem>>, vector<32x32xf32>
    %cst = arith.constant dense<0.000000e+00> : vector<8x32xf32>
    %3 = tpu.matmul %1, %2, %cst {dimension_numbers = #tpu.dot_dimension_numbers<[1], [0], [0], [1], [0, 0, 1, 1], [], []>} : vector<8x32xf32>, vector<32x32xf32>, vector<8x32xf32> -> vector<8x32xf32>
    %c0_4 = arith.constant 0 : index
    %c0_5 = arith.constant 0 : index
    %4 = vector.load %arg3[%c0_4, %c0_5] : memref<32x4xf32, #tpu.memory_space<vmem>>, vector<32x4xf32>
    %cst_6 = arith.constant dense<0.000000e+00> : vector<8x4xf32>
    %5 = tpu.matmul %3, %4, %cst_6 {dimension_numbers = #tpu.dot_dimension_numbers<[1], [0], [0], [1], [0, 0, 1, 1], [], []>} : vector<8x32xf32>, vector<32x4xf32>, vector<8x4xf32> -> vector<8x4xf32>
    %6 = vector.shape_cast %3 : vector<8x32xf32> to vector<1x8x32xf32>
    %7 = vector.shape_cast %5 : vector<8x4xf32> to vector<1x8x4xf32>
    %cst_7 = arith.constant 1.000000e+00 : f32
    %8 = vector.broadcast %cst_7 : f32 to vector<1x8x1xf32>
    %9 = vector.extract_strided_slice %6 {offsets = [0, 0, 0], sizes = [1, 8, 16], strides = [1, 1, 1]} : vector<1x8x32xf32> to vector<1x8x16xf32>
    %10 = vector.extract_strided_slice %7 {offsets = [0, 0, 0], sizes = [1, 8, 1], strides = [1, 1, 1]} : vector<1x8x4xf32> to vector<1x8x1xf32>
    %11 = vector.extract_strided_slice %7 {offsets = [0, 0, 2], sizes = [1, 8, 1], strides = [1, 1, 1]} : vector<1x8x4xf32> to vector<1x8x1xf32>
    %12 = tpu.concatenate %10, %8 in 2 : vector<1x8x1xf32>, vector<1x8x1xf32> -> vector<1x8x2xf32>
    %13 = tpu.concatenate %8, %11 in 2 : vector<1x8x1xf32>, vector<1x8x1xf32> -> vector<1x8x2xf32>
    "tpu.trace_start"() <{level = 10 : i32, message = "bik,bjk->bij"}> : () -> ()
    %cst_8 = arith.constant dense<0.000000e+00> : vector<1x8x8xf32>
    %14 = tpu.matmul %12, %13, %cst_8 {dimension_numbers = #tpu.dot_dimension_numbers<[2], [2], [1], [1], [0, 0, 0, 1, 1, 1], [0], [0]>} : vector<1x8x2xf32>, vector<1x8x2xf32>, vector<1x8x8xf32> -> vector<1x8x8xf32>
    %cst_9 = arith.constant 0.000000e+00 : f32
    "tpu.trace_stop"() : () -> ()
    %15 = vector.broadcast %cst_9 : f32 to vector<1x8x8xf32>
    %16 = arith.cmpf ogt, %14, %15 : vector<1x8x8xf32>
    %cst_10 = arith.constant 2.000000e-01 : f32
    %17 = vector.broadcast %cst_10 : f32 to vector<1x8x8xf32>
    %18 = arith.mulf %17, %14 : vector<1x8x8xf32>
    %19 = arith.select %16, %14, %18 : vector<1x8x8xi1>, vector<1x8x8xf32>
    %cst_11 = arith.constant dense<0xFF800000> : vector<1x8xf32>
    %20 = vector.multi_reduction <maximumf>, %19, %cst_11 [2] : vector<1x8x8xf32> to vector<1x8xf32>
    %21 = vector.shape_cast %20 : vector<1x8xf32> to vector<1x8x1xf32>
    %22 = vector.broadcast %21 : vector<1x8x1xf32> to vector<1x8x8xf32>
    %23 = arith.subf %19, %22 : vector<1x8x8xf32>
    %24 = math.exp %23 : vector<1x8x8xf32>
    %cst_12 = arith.constant dense<0.000000e+00> : vector<1x8xf32>
    %25 = vector.multi_reduction <add>, %24, %cst_12 [2] : vector<1x8x8xf32> to vector<1x8xf32>
    %26 = vector.shape_cast %25 : vector<1x8xf32> to vector<1x8x1xf32>
    %27 = tpu.reciprocal %26 : vector<1x8x1xf32> -> vector<1x8x1xf32>
    %28 = vector.broadcast %27 : vector<1x8x1xf32> to vector<1x8x8xf32>
    %29 = arith.mulf %24, %28 : vector<1x8x8xf32>
    %c0_13 = arith.constant 0 : index
    %c0_14 = arith.constant 0 : index
    %c0_15 = arith.constant 0 : index
    %30 = vector.load %arg4[%c0_13, %c0_14, %c0_15] : memref<2x8x8xf32, #tpu.memory_space<vmem>>, vector<1x8x8xf32>
    %31 = vector.shape_cast %30 : vector<1x8x8xf32> to vector<8x8xf32>
    %32 = vector.shape_cast %31 : vector<8x8xf32> to vector<1x8x8xf32>
    "tpu.trace_start"() <{level = 10 : i32, message = "buv,bvk->buk"}> : () -> ()
    %cst_16 = arith.constant dense<0.000000e+00> : vector<1x8x8xf32>
    %33 = tpu.matmul %32, %29, %cst_16 {dimension_numbers = #tpu.dot_dimension_numbers<[2], [1], [1], [2], [0, 0, 0, 1, 1, 2], [0], [0]>} : vector<1x8x8xf32>, vector<1x8x8xf32>, vector<1x8x8xf32> -> vector<1x8x8xf32>
    "tpu.trace_stop"() : () -> ()
    "tpu.trace_start"() <{level = 10 : i32, message = "buv,bve->bue"}> : () -> ()
    %cst_17 = arith.constant dense<0.000000e+00> : vector<1x8x16xf32>
    %34 = tpu.matmul %33, %9, %cst_17 {dimension_numbers = #tpu.dot_dimension_numbers<[2], [1], [1], [2], [0, 0, 0, 1, 1, 2], [0], [0]>} : vector<1x8x8xf32>, vector<1x8x16xf32>, vector<1x8x16xf32> -> vector<1x8x16xf32>
    %cst_18 = arith.constant 0.000000e+00 : f32
    "tpu.trace_stop"() : () -> ()
    %35 = vector.broadcast %cst_18 : f32 to vector<1x8x16xf32>
    %36 = arith.cmpf ogt, %34, %35 : vector<1x8x16xf32>
    %cst_19 = arith.constant 0.000000e+00 : f32
    %37 = vector.broadcast %cst_19 : f32 to vector<1x8x16xf32>
    %38 = arith.minimumf %34, %37 : vector<1x8x16xf32>
    %39 = math.exp %38 : vector<1x8x16xf32>
    %cst_20 = arith.constant 1.000000e+00 : f32
    %40 = vector.broadcast %cst_20 : f32 to vector<1x8x16xf32>
    %41 = arith.subf %39, %40 : vector<1x8x16xf32>
    %42 = arith.select %36, %34, %41 : vector<1x8x16xi1>, vector<1x8x16xf32>
    %43 = vector.extract_strided_slice %6 {offsets = [0, 0, 16], sizes = [1, 8, 16], strides = [1, 1, 1]} : vector<1x8x32xf32> to vector<1x8x16xf32>
    %44 = vector.extract_strided_slice %7 {offsets = [0, 0, 1], sizes = [1, 8, 1], strides = [1, 1, 1]} : vector<1x8x4xf32> to vector<1x8x1xf32>
    %45 = vector.extract_strided_slice %7 {offsets = [0, 0, 3], sizes = [1, 8, 1], strides = [1, 1, 1]} : vector<1x8x4xf32> to vector<1x8x1xf32>
    %46 = tpu.concatenate %44, %8 in 2 : vector<1x8x1xf32>, vector<1x8x1xf32> -> vector<1x8x2xf32>
    %47 = tpu.concatenate %8, %45 in 2 : vector<1x8x1xf32>, vector<1x8x1xf32> -> vector<1x8x2xf32>
    "tpu.trace_start"() <{level = 10 : i32, message = "bik,bjk->bij"}> : () -> ()
    %cst_21 = arith.constant dense<0.000000e+00> : vector<1x8x8xf32>
    %48 = tpu.matmul %46, %47, %cst_21 {dimension_numbers = #tpu.dot_dimension_numbers<[2], [2], [1], [1], [0, 0, 0, 1, 1, 1], [0], [0]>} : vector<1x8x2xf32>, vector<1x8x2xf32>, vector<1x8x8xf32> -> vector<1x8x8xf32>
    %cst_22 = arith.constant 0.000000e+00 : f32
    "tpu.trace_stop"() : () -> ()
    %49 = vector.broadcast %cst_22 : f32 to vector<1x8x8xf32>
    %50 = arith.cmpf ogt, %48, %49 : vector<1x8x8xf32>
    %cst_23 = arith.constant 2.000000e-01 : f32
    %51 = vector.broadcast %cst_23 : f32 to vector<1x8x8xf32>
    %52 = arith.mulf %51, %48 : vector<1x8x8xf32>
    %53 = arith.select %50, %48, %52 : vector<1x8x8xi1>, vector<1x8x8xf32>
    %cst_24 = arith.constant dense<0xFF800000> : vector<1x8xf32>
    %54 = vector.multi_reduction <maximumf>, %53, %cst_24 [2] : vector<1x8x8xf32> to vector<1x8xf32>
    %55 = vector.shape_cast %54 : vector<1x8xf32> to vector<1x8x1xf32>
    %56 = vector.broadcast %55 : vector<1x8x1xf32> to vector<1x8x8xf32>
    %57 = arith.subf %53, %56 : vector<1x8x8xf32>
    %58 = math.exp %57 : vector<1x8x8xf32>
    %cst_25 = arith.constant dense<0.000000e+00> : vector<1x8xf32>
    %59 = vector.multi_reduction <add>, %58, %cst_25 [2] : vector<1x8x8xf32> to vector<1x8xf32>
    %60 = vector.shape_cast %59 : vector<1x8xf32> to vector<1x8x1xf32>
    %61 = tpu.reciprocal %60 : vector<1x8x1xf32> -> vector<1x8x1xf32>
    %62 = vector.broadcast %61 : vector<1x8x1xf32> to vector<1x8x8xf32>
    %63 = arith.mulf %58, %62 : vector<1x8x8xf32>
    %c1 = arith.constant 1 : index
    %c0_26 = arith.constant 0 : index
    %c0_27 = arith.constant 0 : index
    %64 = vector.load %arg4[%c1, %c0_26, %c0_27] : memref<2x8x8xf32, #tpu.memory_space<vmem>>, vector<1x8x8xf32>
    %65 = vector.shape_cast %64 : vector<1x8x8xf32> to vector<8x8xf32>
    %66 = vector.shape_cast %65 : vector<8x8xf32> to vector<1x8x8xf32>
    "tpu.trace_start"() <{level = 10 : i32, message = "buv,bvk->buk"}> : () -> ()
    %cst_28 = arith.constant dense<0.000000e+00> : vector<1x8x8xf32>
    %67 = tpu.matmul %66, %63, %cst_28 {dimension_numbers = #tpu.dot_dimension_numbers<[2], [1], [1], [2], [0, 0, 0, 1, 1, 2], [0], [0]>} : vector<1x8x8xf32>, vector<1x8x8xf32>, vector<1x8x8xf32> -> vector<1x8x8xf32>
    "tpu.trace_stop"() : () -> ()
    "tpu.trace_start"() <{level = 10 : i32, message = "buv,bve->bue"}> : () -> ()
    %cst_29 = arith.constant dense<0.000000e+00> : vector<1x8x16xf32>
    %68 = tpu.matmul %67, %43, %cst_29 {dimension_numbers = #tpu.dot_dimension_numbers<[2], [1], [1], [2], [0, 0, 0, 1, 1, 2], [0], [0]>} : vector<1x8x8xf32>, vector<1x8x16xf32>, vector<1x8x16xf32> -> vector<1x8x16xf32>
    %cst_30 = arith.constant 0.000000e+00 : f32
    "tpu.trace_stop"() : () -> ()
    %69 = vector.broadcast %cst_30 : f32 to vector<1x8x16xf32>
    %70 = arith.cmpf ogt, %68, %69 : vector<1x8x16xf32>
    %cst_31 = arith.constant 0.000000e+00 : f32
    %71 = vector.broadcast %cst_31 : f32 to vector<1x8x16xf32>
    %72 = arith.minimumf %68, %71 : vector<1x8x16xf32>
    %73 = math.exp %72 : vector<1x8x16xf32>
    %cst_32 = arith.constant 1.000000e+00 : f32
    %74 = vector.broadcast %cst_32 : f32 to vector<1x8x16xf32>
    %75 = arith.subf %73, %74 : vector<1x8x16xf32>
    %76 = arith.select %70, %68, %75 : vector<1x8x16xi1>, vector<1x8x16xf32>
    %77 = tpu.concatenate %42, %76 in 2 : vector<1x8x16xf32>, vector<1x8x16xf32> -> vector<1x8x32xf32>
    %c0_33 = arith.constant 0 : index
    %c0_34 = arith.constant 0 : index
    %c0_35 = arith.constant 0 : index
    %78 = vector.load %arg5[%c0_33, %c0_34, %c0_35] : memref<1x8x32xf32, #tpu.memory_space<vmem>>, vector<1x8x32xf32>
    tpu.vector_store %arg5[%c0_33, %c0_34, %c0_35], %77 {strides = array<i32>} : memref<1x8x32xf32, #tpu.memory_space<vmem>>, vector<1x8x32xf32>,
    return
  }
  func.func @transform_0(%arg0: i32) -> (i32, i32, i32) {
    %c0_i32 = arith.constant 0 : i32
    %c0_i32_0 = arith.constant 0 : i32
    %c0_i32_1 = arith.constant 0 : i32
    return %arg0, %c0_i32, %c0_i32_0 : i32, i32, i32
  }
  func.func @transform_1(%arg0: i32) -> (i32, i32) {
    %c0_i32 = arith.constant 0 : i32
    %c0_i32_0 = arith.constant 0 : i32
    %c0_i32_1 = arith.constant 0 : i32
    return %c0_i32, %c0_i32_0 : i32, i32
  }
  func.func @transform_2(%arg0: i32) -> (i32, i32) {
    %c0_i32 = arith.constant 0 : i32
    %c0_i32_0 = arith.constant 0 : i32
    %c0_i32_1 = arith.constant 0 : i32
    return %c0_i32, %c0_i32_0 : i32, i32
  }
  func.func @transform_3(%arg0: i32) -> (i32, i32, i32) {
    %c0_i32 = arith.constant 0 : i32
    %c0_i32_0 = arith.constant 0 : i32
    %c0_i32_1 = arith.constant 0 : i32
    %c0_i32_2 = arith.constant 0 : i32
    return %c0_i32, %c0_i32_0, %c0_i32_1 : i32, i32, i32
  }
  func.func @transform_4(%arg0: i32) -> (i32, i32, i32) {
    %c0_i32 = arith.constant 0 : i32
    %c0_i32_0 = arith.constant 0 : i32
    %c0_i32_1 = arith.constant 0 : i32
    return %arg0, %c0_i32, %c0_i32_0 : i32, i32, i32
  }
}

</mosaic_0001>

<bundles_post_ra>
// kernel: sub.0
= control target key start
LH: loop header
LB: loop body
LE: loop exit
PB: predicated region body
PF: predicated region fallthrough
CT: control target
= control target key end

     0   :  { %s34_s0 = inlined_call_operand.vmem [shape: f32[2], index: 0, kind: input, shape index: {}]   ;;  %s35_s1 = inlined_call_operand.vmem [shape: f32[2], index: 1, kind: input, shape index: {}]   ;;  %s36_s2 = inlined_call_operand.vmem [shape: f32[2], index: 2, kind: output, shape index: {}]  }
   0x1   :  { %v3_v0 = vld [vmem:[%s34_s0] sm:$0x1] }
   0x2   :  { %v4_v1 = vld [vmem:[%s35_s1] sm:$0x1] }
   0x3   :  { %v7_v2 = vsub.f32 %v3_v0, %v4_v1 }
   0x5   :  { %9 = vst [vmem:[%s36_s2] sm:$0x1] %v7_v2 }

// kernel: gat_multihead.1
= control target key start
LH: loop header
LB: loop body
LE: loop exit
PB: predicated region body
PF: predicated region fallthrough
CT: control target
= control target key end

     0   :  { %9 = vsyncpa [#allocation3], 0  ;;  %s863_s0 = inlined_call_operand.vmem [shape: f32[2,8,32], index: 0, kind: input, shape index: {}]   ;;  %s864_s1 = inlined_call_operand.vmem [shape: f32[32,32], index: 1, kind: input, shape index: {}]   ;;  %s865_s2 = inlined_call_operand.vmem [shape: f32[32,4], index: 2, kind: input, shape index: {}]   ;;  %s866_s3 = inlined_call_operand.vmem [shape: f32[2,8,8], index: 3, kind: input, shape index: {}]   ;;  %s867_s4 = inlined_call_operand.hbm [shape: f32[2,8,32], index: 4, kind: output, shape index: {}]  }
   0x1   :  { %11 = vsyncpa [#allocation3 + $0x1], 0  ;;  %s732_s15 = smov 0   ;;  %s734_s16 = smov 0  }
   0x2   :  { %s736_s17 = smov 0   ;;  %s738_s18 = smov 0  }
   0x3 LB: > { %s753_s19 = sadd.s32 4294967295, %s701_s18   ;;  %s561_s20 = sadd.s32 4294967294, %s701_s18   ;;  %s701_s18 = sphi %s738_s18, %s873_s18   ;;  %s697_s17 = sphi %s736_s17, %s872_s17   ;;  %s693_s16 = sphi %s734_s16, %s871_s16   ;;  %s689_s15 = sphi %s732_s15, %s870_s15  }
   0x4   : > { %s757_s21 = sadd.s32 1, %s701_s18   ;;  %s113_s22 = sadd.s32 1, %s697_s17 }
   0x5   : > { %s110_s23 = ssub.s32 %s701_s18, %s757_s21  ;;  %p123_p0 = scmp.ne.s32.totalorder %s697_s17, %s693_s16 }
   0x6   : > { %p111_p1 = scmp.eq.s32.totalorder %s110_s23, 0  ;;  %p124_p2 = scmp.eq.s32.totalorder %s753_s19, 1 }
   0x7   : > { %p129_p3 = scmp.ne.s32.totalorder %s693_s16, %s689_s15  ;;  %p130_p4 = scmp.eq.s32.totalorder %s561_s20, 1 }
   0x8   : > { %s768_s24 = scalar_select %p111_p1, %s697_s17, %s113_s22  }
   0x9   : > { %p770_p5 = por %p124_p2, %p123_p0  ;;  %p774_p6 = por %p130_p4, %p129_p3 }
   0xa   : > { %p564_p7 = scmp.ge.s32.totalorder %s701_s18, 1  ;;  %p164_p8 = scmp.lt.s32.totalorder %s701_s18, 3 }
   0xc   : > { %p165_p9 = pnand %p564_p7, %p164_p8 }
   0xd   : > { %p189_p10 = scmp.lt.s32.totalorder (!%p165_p9), %s753_s19, 1  ;;  %s703_s5 = smov (!%p165_p9), 127  }
   0xe   : > { %168 = sbr.rel (%p165_p9) target bundleno = 1191 (0x4a7), region = 36  ;;  %s704_s6 = smov (!%p165_p9), 126  }
   0xf   : > { %s705_s7 = smov (!%p165_p9), 112   ;;  %s706_s12 = smov (!%p165_p9), 16  }
  0x10   : > { %s186_s13 = sand.u32 (!%p165_p9), 1, %s693_s16   ;;  %s581_s20 = sshll.u32 (!%p165_p9), %s753_s19, 3 }
  0x11   : > { %s565_s14 = sshll.u32 (!%p165_p9), %s186_s13, 3  ;;  %s497_s27 = scalar_lea.hbm (!%p165_p9), %s867_s4, %s581_s20 }
  0x12   : > { %s501_s30 = sshll.u32 (!%p165_p9), %s497_s27, 4  ;;  %s659_s9 = scalar_lea.hbm (!%p165_p9), %s867_s4, 16  ;;  %s502_s30 = int_to_ptr.hbm [resolvable:$true] %s501_s30 }
  0x13   : > { %v197_v0 = vld [vmem:[%s864_s1 + $0x18] sm:$0xff]  ;;  %v196_v1 = vld [vmem:[%s864_s1 + $0x10] sm:$0xff]  ;;  %v195_v4 = vld [vmem:[%s864_s1 + $0x8] sm:$0xff]  ;;  %s190_s11 = scalar_select %p189_p10, %s753_s19, 1  ;;  %vm198_vm0 = vcmask 261120   ;;  %vm256_vm1 = vcmask 15360  }
  0x14   : > { %214 = vmatpush.msra.mxu0 %v197_v0  ;;  %v225_v2 = vld [vmem:[%s865_s2 + $0x18] sm:$0xff]  ;;  %v224_v3 = vld [vmem:[%s865_s2 + $0x10] sm:$0xff]  ;;  %v223_v5 = vld [vmem:[%s865_s2 + $0x8] sm:$0xff]  ;;  %vm249_vm2 = vcmask 7168   ;;  %vm286_vm4 = vcmask 64512   ;;  %s487_s19 = scalar_lea.sflag [#allocation3], %s186_s13 }
  0x15   : > { %241 = vmatpush.msra.mxu1 %v225_v2  ;;  %v194_v6 = vld [vmem:[%s864_s1] sm:$0xff]  ;;  %s566_s22 = sshll.u32 %s190_s11, 3  ;;  %v576_v52 = vld [vmem:[%s866_s3 + $0x8] sm:$0xff] }
  0x16   : > { %215 = vmatpush.msra.mxu0 %v196_v1  ;;  %s192_s28 = scalar_lea.vmem %s863_s0, %s566_s22  ;;  %v222_v8 = vld [vmem:[%s865_s2] sm:$0xff] }
  0x17   : > { %242 = vmatpush.msra.mxu1 %v224_v3  ;;  %v193_v7 = vld [vmem:[%s192_s28] sm:$0xff]  ;;  %s188_s28 = scalar_lea.vmem [#allocation2], %s565_s14 }
  0x18   : > { %216 = vmatpush.msra.mxu0 %v195_v4  ;;  %v311_v61 = vld [vmem:[%s866_s3] sm:$0xff]  ;;  %s499_s29 = sshll.u32 %s188_s28, 4  ;;  %s500_s29 = int_to_ptr.vmem [resolvable:$true] %s499_s29 }
  0x19   : > { %243 = vmatpush.msra.mxu1 %v223_v5 }
  0x1a   : > { %217 = vmatpush.msra.mxu0 %v194_v6 }
  0x1b   : > { %567 = vmatmul.msk.f32.vlgmr.msra.gmra.mxu0 %vm198_vm0, %v193_v7  ;;  %244 = vmatpush.msra.mxu1 %v222_v8 }
  0x98   : > { %v810_v9 = vpop.f32.mrf.mxu0 }
  0x99   : > { %568 = vmatmul.msk.f32.vlgmr.msra.gmra.mxu1 %vm198_vm0, %v810_v9 }
 0x116   : > { %v246_v10 = vpop.f32.mrf.mxu1 }
 0x117   : > { %252 = vrot.lane.b32.xlu0 %v246_v10, %s703_s5  ;;  %v250_v13 = vsel %vm249_vm2, %v246_v10, 1.0  ;;  %s653_s5 = sshra.s32 %s502_s30, 4  ;;  %s654_s5 = int_to_ptr.hbm [resolvable:$true] %s653_s5 }
 0x118   : > { %p660_p0 = scmp.lt.s32.totalorder %s654_s5, %s867_s4 }
 0x11f   : > { %365 = vrot.lane.b32.xlu0 %v246_v10, %s704_s6  ;;  %s655_s6 = scalar_lea.hbm %s654_s5, 8 }
 0x120   : > { %p656_p11 = scmp.ne.s32.totalorder %s654_s5, %s655_s6  ;;  %p661_p1 = scmp.lt.s32.totalorder %s659_s9, %s655_s6 }
 0x122   : > { %p657_p12 = pnand %p656_p11, %p770_p5  ;;  %p662_p2 = por %p661_p1, %p660_p0 }
 0x124   : > { %p658_p13 = pneg %p657_p12 }
 0x126   : > { %p663_p3 = pnand %p662_p2, %p658_p13 }
 0x127   : > { %447 = vrot.lane.b32.xlu0 %v810_v9, %s705_s7 }
 0x189   : > { %v253_v11 = vpop.permute.xlu0 %252 }
 0x18a   : > { %v255_v12 = vsel %vm249_vm2, 1.0, %v253_v11  ;;  %v364_v16 = vsel %vm249_vm2, %v253_v11, 1.0 }
 0x18b   : > { %569 = vmatpush.xpose.msk.msra.mxu2 %vm256_vm1, %v255_v12 }
 0x18e   : > { %570 = vmatmul.msk.f32.vlgmr.msra.gmra.mxu2 %vm256_vm1, %v250_v13 }
 0x191   : > { %v366_v14 = vpop.permute.xlu0 %365 }
 0x192   : > { %v368_v15 = vsel %vm249_vm2, 1.0, %v366_v14 }
 0x193   : > { %574 = vmatpush.xpose.msk.msrb.mxu2 %vm256_vm1, %v368_v15 }
 0x196   : > { %575 = vmatmul.msk.f32.vlgmr.msrb.gmra.mxu2 %vm256_vm1, %v364_v16  ;;  %vm483_vm1 = vcmask 130048  }
 0x199   : > { %v448_v17 = vpop.permute.xlu0 %447 }
 0x19a   : > { %468 = vmatpush.msrb.mxu1 %v448_v17 }
 0x211   : > { %v280_v18 = vpop.f32.mrf.mxu2 }
 0x212   : > { %v284_v23 = vmul.f32 0.2, %v280_v18  ;;  %vm283_vm5 = vcmp.gt.f32.partialorder %v280_v18, 0.0 }
 0x214   : > { %v285_v24 = vsel %vm283_vm5, %v280_v18, %v284_v23 }
 0x215   : > { %v287_v25 = vsel %vm286_vm4, %v285_v24, -inf }
 0x219   : > { %v392_v19 = vpop.f32.mrf.mxu2 }
 0x21a   : > { %vm395_vm3 = vcmp.gt.f32.partialorder %v392_v19, 0.0  ;;  %v396_v20 = vmul.f32 0.2, %v392_v19 }
 0x21c   : > { %v397_v21 = vsel %vm395_vm3, %v392_v19, %v396_v20 }
 0x21d   : > { %v398_v22 = vsel %vm286_vm4, %v397_v21, -inf }
 0x21e   : > { %399 = vmax.xlane.f32.xlu1 %v398_v22 }
 0x226   : > { %288 = vmax.xlane.f32.xlu1 %v287_v25 }
 0x291   : > { %v400_v26 = vpop.xlane.xlu1 %399 }
 0x292   : > { %v401_v27 = vsub.f32 %v397_v21, %v400_v26 }
 0x294   : > { %v402_v28 = vmul.f32 1.442695, %v401_v27 }
 0x296   : > { %627 = vpow2.f32 %v402_v28 }
 0x299   : > { %v289_v29 = vpop.xlane.xlu1 %288 }
 0x29a   : > { %v290_v30 = vsub.f32 %v285_v24, %v289_v29 }
 0x29c   : > { %v628_v31 = vpop.eup %627  ;;  %v291_v32 = vmul.f32 1.442695, %v290_v30 }
 0x29d   : > { %v404_v33 = vsel %vm286_vm4, %v628_v31, 0.0 }
 0x29e   : > { %629 = vpow2.f32 %v291_v32  ;;  %405 = vadd.xlane.f32.xlu2 %v404_v33 }
 0x2a4   : > { %v630_v34 = vpop.eup %629 }
 0x2a5   : > { %v293_v35 = vsel %vm286_vm4, %v630_v34, 0.0 }
 0x2a6   : > { %294 = vadd.xlane.f32.xlu2 %v293_v35 }
 0x311   : > { %v406_v36 = vpop.xlane.xlu2 %405 }
 0x312   : > { %631 = vrcp.f32 %v406_v36  ;;  %v418_v41 = vand.u32 2147483648, %v406_v36  ;;  %v416_v43 = vand.u32 2147483647, %v406_v36  ;;  %vm412_vm7 = vweird.f32 %v406_v36 }
 0x314   : > { %v419_v46 = vor.u32 1.1754944e-38, %v418_v41  ;;  %vm417_vm9 = vcmp.eq.f32.partialorder %v416_v43, 8.507059e+37 }
 0x318   : > { %v632_v37 = vpop.eup %631 }
 0x319   : > { %v408_v38 = vmul.f32 %v632_v37, %v406_v36  ;;  %v295_v39 = vpop.xlane.xlu2 %294  ;;  %vm413_vm6 = vweird.f32 %v632_v37 }
 0x31a   : > { %633 = vrcp.f32 %v295_v39  ;;  %vm414_vm8 = vmor %vm412_vm7, %vm413_vm6  ;;  %v307_v53 = vand.u32 2147483648, %v295_v39  ;;  %v305_v55 = vand.u32 2147483647, %v295_v39  ;;  %vm301_vm11 = vweird.f32 %v295_v39 }
 0x31b   : > { %v409_v40 = vsub.f32 1.0, %v408_v38 }
 0x31c   : > { %v308_v57 = vor.u32 1.1754944e-38, %v307_v53  ;;  %vm306_vm13 = vcmp.eq.f32.partialorder %v305_v55, 8.507059e+37 }
 0x31d   : > { %v410_v42 = vmul.f32 %v632_v37, %v409_v40 }
 0x31f   : > { %v411_v44 = vadd.f32 %v632_v37, %v410_v42 }
 0x320   : > { %v634_v45 = vpop.eup %633 }
 0x321   : > { %v297_v47 = vmul.f32 %v634_v45, %v295_v39  ;;  %v415_v48 = vsel %vm414_vm8, %v632_v37, %v411_v44  ;;  %vm302_vm10 = vweird.f32 %v634_v45 }
 0x322   : > { %v420_v49 = vsel %vm417_vm9, %v419_v46, %v415_v48  ;;  %vm303_vm12 = vmor %vm301_vm11, %vm302_vm10 }
 0x323   : > { %v298_v50 = vsub.f32 1.0, %v297_v47  ;;  %v421_v51 = vmul.f32 %v628_v31, %v420_v49 }
 0x325   : > { %v299_v54 = vmul.f32 %v634_v45, %v298_v50  ;;  %442 = vmatpush.msrb.mxu0 %v421_v51 }
 0x326   : > { %577 = vmatmul.msk.f32.vlgmr.msrb.gmra.mxu0 %vm286_vm4, %v576_v52 }
 0x327   : > { %v300_v56 = vadd.f32 %v634_v45, %v299_v54 }
 0x329   : > { %v304_v58 = vsel %vm303_vm12, %v634_v45, %v300_v56 }
 0x32a   : > { %v309_v59 = vsel %vm306_vm13, %v308_v57, %v304_v58 }
 0x32b   : > { %v310_v60 = vmul.f32 %v630_v34, %v309_v59 }
 0x32d   : > { %330 = vmatpush.msra.mxu3 %v310_v60 }
 0x32e   : > { %571 = vmatmul.msk.f32.vlgmr.msra.gmra.mxu3 %vm286_vm4, %v311_v61 }
 0x32f   : > { %353 = vmatpush.msrb.mxu3 %v810_v9 }
 0x3a3   : > { %v444_v62 = vpop.f32.mrf.mxu0 }
 0x3a4   : > { %578 = vmatmul.msk.f32.vlgmr.msrb.gmra.mxu1 %vm286_vm4, %v444_v62 }
 0x3b1   : > { %v332_v63 = vpop.f32.mrf.mxu3 }
 0x3b2   : > { %572 = vmatmul.msk.f32.vlgmr.msrb.gmra.mxu3 %vm286_vm4, %v332_v63 }
 0x421   : > { %v470_v0 = vpop.f32.mrf.mxu1 }
 0x422   : > { %v474_v1 = vmin.f32 %v470_v0, 0.0  ;;  %vm473_vm14 = vcmp.gt.f32.partialorder %v470_v0, 0.0 }
 0x424   : > { %v475_v2 = vmul.f32 1.442695, %v474_v1 }
 0x426   : > { %635 = vpow2.f32 %v475_v2 }
 0x42c   : > { %v636_v3 = vpop.eup %635 }
 0x42d   : > { %v579_v4 = vadd.f32 -1.0, %v636_v3 }
 0x42f   : > { %v478_v5 = vsel %vm473_vm14, %v470_v0, %v579_v4 }
 0x430   : > { %480 = vrot.lane.b32.xlu1 %v478_v5, %s706_s12 }
 0x435   : > { %v355_v6 = vpop.f32.mrf.mxu3 }
 0x436   : > { %v359_v7 = vmin.f32 %v355_v6, 0.0  ;;  %vm358_vm15 = vcmp.gt.f32.partialorder %v355_v6, 0.0 }
 0x438   : > { %v360_v8 = vmul.f32 1.442695, %v359_v7 }
 0x43a   : > { %637 = vpow2.f32 %v360_v8 }
 0x440   : > { %v638_v9 = vpop.eup %637 }
 0x441   : > { %v573_v10 = vadd.f32 -1.0, %v638_v9 }
 0x443   : > { %v363_v11 = vsel %vm358_vm15, %v355_v6, %v573_v10 }
 0x4a2   : > { %v481_v12 = vpop.permute.xlu1 %480 }
 0x4a3   : > { %v484_v13 = vsel %vm483_vm1, %v363_v11, %v481_v12 }
 0x4a4   : > { %485 = vst.msk [vmem:[%s188_s28] sm:$0xff] %vm198_vm0, %v484_v13 }
 0x4a5   : > { %666 = shalt.err (!%p663_p3)
}
 0x4a6   : > { %584 = dma.vmem_to_hbm [thread:$0]  (%p770_p5), %s500_s29, 128, %s502_s30, %s487_s19  }
 0x4a7 PF: > { %p590_p4 = scmp.ge.s32.totalorder %s701_s18, 2  ;;  %s513_s12 = sand.u32 1, %s689_s15  }
 0x4a8   : > { %s514_s13 = scalar_lea.sflag [#allocation3], %s513_s12 }
 0x4a9   : > { %p587_p7 = pnand %p590_p4, %p774_p6 }
 0x4ab   : > { %p588_p8 = pneg %p587_p7 }
 0x4ad   : > { %684 = dma.done.wait (%p588_p8), %s514_s13, 128  }
 0x4ae   : > { %686 = vsyncadd (%p588_p8), %s514_s13, 4294967168  ;;  %p14_p9 = scmp.ge.s32.totalorder %s757_s21, 4   ;;  %s870_s15 = smov %s693_s16 }
 0x4af   : > { %s871_s16 = smov %s697_s17  ;;  %s872_s17 = smov %s768_s24 }
 0x4b0   : > { %s873_s18 = smov %s757_s21  ;;  %16 = sbr.rel (!%p14_p9) target bundleno = 3 (0x3), region = 72 }
 0x4b5   :  { %520 = vsyncpa [#allocation3], 1 }
 0x4b6   :  { %522 = vsyncpa [#allocation3 + $0x1], 1 }

</bundles_post_ra>
